<compile_context>
chip_gen: v7x
topology: tpu7x:2x2x1
jax: 0.10.0
libtpu: 0.0.40
codegen_flags: <defaults>
</compile_context>

<pallas_src>
import functools

import jax
import jax.numpy as jnp
from jax.experimental import pallas as pl
from jax.experimental.pallas import tpu as pltpu


def _round_up(x, m):
    return ((x + m - 1) // m) * m


def _dyn_mse_kernel(pred_ref, gt_ref, sum_ref, cnt_ref, acc_sum, acc_cnt,
                    *, n_rows, tile_rows, lane_width, blocks_per_split):
    c = pl.program_id(0)          # parallel split (TensorCore) index
    i = pl.program_id(1)          # sequential block index within the split

    @pl.when(i == 0)
    def _():
        acc_sum[...] = jnp.zeros_like(acc_sum)
        acc_cnt[...] = jnp.zeros_like(acc_cnt)

    g = gt_ref[...].astype(jnp.float32)
    p = pred_ref[...].astype(jnp.float32)
    d = p - g
    dsq = d * d

    # (x, y) pairs sit on adjacent lanes (lane_width is even, rows start at
    # even global offsets).  A single lane rotation aligns each element with
    # its partner at exactly one lane of every pair; the same rotation applied
    # to the squared error gives dx^2+dy^2 at those same lanes.
    g_rot = pltpu.roll(g, shift=1, axis=1)
    dsq_rot = pltpu.roll(dsq, shift=1, axis=1)
    pair_g = g + g_rot          # gt_x + gt_y   (valid on partner_ok lanes)
    pair_dsq = dsq + dsq_rot    # dx^2 + dy^2   (valid on partner_ok lanes)

    # Roll-convention-independent (1, lane_width) mask of the lanes where the
    # rotation brought the true partner (lane ^ 1).  Tiny: no full-block
    # selects, no runtime direction probe on full blocks.
    lane = jax.lax.broadcasted_iota(jnp.int32, (1, lane_width), 1)
    partner_ok = pltpu.roll(lane, shift=1, axis=1) == (lane ^ 1)

    def accumulate(keep):
        # jnp.where (select), not multiply, so garbage/NaN in padded regions
        # cannot leak into the sums.
        sq = jnp.where(keep, pair_dsq, 0.0)
        cnt = jnp.where(keep, 2.0, 0.0)           # 2 elements per kept pair
        acc_sum[...] += jnp.sum(sq, axis=0, keepdims=True)   # (1, lane_width)
        acc_cnt[...] += jnp.sum(cnt, axis=0, keepdims=True)

    blk = c * blocks_per_split + i                # logical (unclamped) block id
    is_interior = (blk + 1) * tile_rows <= n_rows

    @pl.when(is_interior)                          # fully-valid block: no iotas
    def _():
        accumulate((pair_g != 0.0) & partner_ok)

    @pl.when(jnp.logical_not(is_interior))         # ragged / duplicated block
    def _():
        row = jax.lax.broadcasted_iota(jnp.int32, (tile_rows, lane_width), 0)
        row_ok = row < (n_rows - blk * tile_rows)
        accumulate((pair_g != 0.0) & partner_ok & row_ok)

    @pl.when(i == pl.num_programs(1) - 1)
    def _():
        sum_ref[0] = acc_sum[...]
        cnt_ref[0] = acc_cnt[...]


def _tail_loss_terms(pr_tail, gt_tail):
    """Masked sq-error sum and element count for a tiny (< lane_width) tail."""
    gt2 = gt_tail.reshape(-1, 2).astype(jnp.float32)
    pr2 = pr_tail.reshape(-1, 2).astype(jnp.float32)
    keep = (gt2[:, 0:1] + gt2[:, 1:2]) != 0.0
    sq = jnp.where(keep, (pr2 - gt2) ** 2, 0.0)
    return jnp.sum(sq), 2.0 * jnp.sum(keep.astype(jnp.float32))


def _device_defaults():
    """(tile_rows, num_splits) tuned per TPU generation; conservative fallback."""
    kind = ""
    try:
        kind = jax.devices()[0].device_kind.lower()
    except Exception:
        pass
    if "v6" in kind:                      # v6e: 1 TC, 32 MiB scoped-VMEM default
        return 2048, 1                    #   4 MiB blocks -> 16 MiB of buffers
    if "7x" in kind or "v7" in kind:      # v7x: 2 TCs, 64 MiB physical VMEM
        return 2048, 2
    return 1024, 1                        # v5e & unknown: fits 16 MiB default


def dynamic_mse_loss(pred, ground_truth, *, tile_rows=None, num_splits=None):
    """Pallas implementation of DynamicMSELoss.forward."""
    pr = pred.reshape(-1)
    gt = ground_truth.reshape(-1)
    assert pr.shape == gt.shape
    n = pr.shape[0]
    assert n % 2 == 0, "inputs must be viewable as (-1, 2)"

    dft_rows, dft_splits = _device_defaults()
    tile_rows = dft_rows if tile_rows is None else tile_rows
    num_splits = dft_splits if num_splits is None else num_splits

    # Zero-copy lane-dense view: widest lane width (multiple of 128) dividing
    # n makes the (rows, lane_width) reshape a free bitcast (no padded copy).
    lane_width = next((lw for lw in (512, 256, 128) if n % lw == 0), 0)
    if lane_width:
        n_main = n
    else:
        # Ragged n: the < 128-element tail is handled with plain jnp below;
        # the aligned prefix goes through the kernel.  (The prefix slice may
        # still materialize a copy in XLA; only hit when n % 128 != 0.)
        lane_width = 128
        n_main = (n // lane_width) * lane_width

    tail_sq = jnp.float32(0.0)
    tail_cnt = jnp.float32(0.0)
    if n_main < n:
        tail_sq, tail_cnt = _tail_loss_terms(pr[n_main:], gt[n_main:])
    if n_main == 0:                       # tiny input: everything in the tail
        return tail_sq / tail_cnt

    pr_m = pr if n_main == n else pr[:n_main]
    gt_m = gt if n_main == n else gt[:n_main]
    rows = n_main // lane_width
    pr_m = pr_m.reshape(rows, lane_width)
    gt_m = gt_m.reshape(rows, lane_width)

    # Keep block byte size independent of the chosen lane width.
    tile_rows = _round_up(tile_rows, 8) * (512 // lane_width)
    tr = min(tile_rows, _round_up(rows, 8))       # multiple of 8
    nblocks = pl.cdiv(rows, tr)
    num_splits = max(1, min(num_splits, nblocks))
    bps = pl.cdiv(nblocks, num_splits)            # blocks per parallel split

    kernel = functools.partial(
        _dyn_mse_kernel, n_rows=rows, tile_rows=tr, lane_width=lane_width,
        blocks_per_split=bps)

    def in_map(c, i):
        # Clamp so a trailing split never indexes past the last block; the
        # duplicated block it may re-read is fully row-masked in-kernel.
        return (jnp.minimum(c * bps + i, nblocks - 1), 0)

    part_sum, part_cnt = pl.pallas_call(
        kernel,
        out_shape=(
            jax.ShapeDtypeStruct((num_splits, 1, lane_width), jnp.float32),
            jax.ShapeDtypeStruct((num_splits, 1, lane_width), jnp.float32),
        ),
        grid_spec=pltpu.PrefetchScalarGridSpec(
            num_scalar_prefetch=0,
            grid=(num_splits, bps),
            in_specs=[
                pl.BlockSpec((tr, lane_width), in_map),
                pl.BlockSpec((tr, lane_width), in_map),
            ],
            out_specs=[
                pl.BlockSpec((1, 1, lane_width), lambda c, i: (c, 0, 0)),
                pl.BlockSpec((1, 1, lane_width), lambda c, i: (c, 0, 0)),
            ],
            scratch_shapes=[
                pltpu.VMEM((1, lane_width), jnp.float32),   # running sq error
                pltpu.VMEM((1, lane_width), jnp.float32),   # running count
            ],
        ),
        compiler_params=pltpu.CompilerParams(
            dimension_semantics=("parallel", "arbitrary")),
    )(pr_m, gt_m)

    total_sq = jnp.sum(part_sum) + tail_sq
    total_cnt = jnp.sum(part_cnt) + tail_cnt
    # total_cnt == 0 (no kept rows) yields NaN, matching nn.MSELoss on an
    # empty selection.
    return total_sq / total_cnt


def _reference(pred, ground_truth):
    """Pure-JAX reference mirroring the PyTorch module."""
    gt = ground_truth.reshape(-1, 2).astype(jnp.float32)
    pr = pred.reshape(-1, 2).astype(jnp.float32)
    keep = (jnp.sum(gt, axis=1) != 0.0)[:, None]
    sq = jnp.where(keep, (pr - gt) ** 2, 0.0)
    return jnp.sum(sq) / (2.0 * jnp.sum(keep.astype(jnp.float32)))


if __name__ == "__main__":
    key = jax.random.PRNGKey(0)
    k1, k2, k3 = jax.random.split(key, 3)

    # Coordinate-regression-style inputs: batch=2, 333 points, 2 coords.
    # n = 1332 is not a multiple of 128, so this exercises the ragged-tail
    # path (aligned prefix in the kernel + tiny jnp tail).
    pred = jax.random.normal(k1, (2, 333, 2), dtype=jnp.float32)
    gt = jax.random.normal(k2, (2, 333, 2), dtype=jnp.float32)
    drop = jax.random.bernoulli(k3, p=0.3, shape=(2, 333, 1))
    gt = jnp.where(drop, 0.0, gt)   # ~30% of rows zero -> dynamic mask active

    loss = dynamic_mse_loss(pred, gt)
    jax.block_until_ready(loss)
    ref = _reference(pred, gt)
    assert jnp.allclose(loss, ref, rtol=1e-5, atol=1e-6), (loss, ref)

    # Zero-copy path (n % 512 == 0) plus multi-block accumulation and the
    # 2-way parallel split, exercised at small shapes by overriding tiling.
    pred2 = jax.random.normal(k1, (4, 1024, 2), dtype=jnp.float32)
    gt2 = jax.random.normal(k2, (4, 1024, 2), dtype=jnp.float32)
    drop2 = jax.random.bernoulli(k3, p=0.4, shape=(4, 1024, 1))
    gt2 = jnp.where(drop2, 0.0, gt2)
    ref2 = _reference(pred2, gt2)
    for kwargs in ({"tile_rows": 8, "num_splits": 1},
                   {"tile_rows": 8, "num_splits": 2},
                   {}):
        l2 = dynamic_mse_loss(pred2, gt2, **kwargs)
        jax.block_until_ready(l2)
        assert jnp.allclose(l2, ref2, rtol=1e-5, atol=1e-6), (kwargs, l2, ref2)

    print("KERNEL_OK")
</pallas_src>

<mosaic_0001>
module attributes {stable_mosaic.version = 11 : i64} {
  func.func @_dyn_mse_kernel(%arg0: i32, %arg1: i32, %arg2: memref<16x128xf32, #tpu.memory_space<vmem>>, %arg3: memref<16x128xf32, #tpu.memory_space<vmem>>, %arg4: memref<1x1x128xf32, #tpu.memory_space<vmem>>, %arg5: memref<1x1x128xf32, #tpu.memory_space<vmem>>, %arg6: memref<1x128xf32, #tpu.memory_space<vmem>>, %arg7: memref<1x128xf32, #tpu.memory_space<vmem>>) attributes {dimension_semantics = [#tpu.dimension_semantics<parallel>, #tpu.dimension_semantics<arbitrary>], iteration_bounds = array<i64: 1, 1>, scalar_prefetch = 0 : i64, scratch_operands = 2 : i64, tpu.core_type = #tpu.core_type<tc>, window_params = [{transform_indices = @transform_0, window_bounds = array<i64: 16, 128>}, {transform_indices = @transform_1, window_bounds = array<i64: 16, 128>}, {transform_indices = @transform_2, window_bounds = array<i64: 1, 1, 128>}, {transform_indices = @transform_3, window_bounds = array<i64: 1, 1, 128>}]} {
    %c0_i32 = arith.constant 0 : i32
    %0 = arith.cmpi eq, %arg1, %c0_i32 : i32
    %1 = arith.extui %0 : i1 to i32
    %c0_i32_0 = arith.constant 0 : i32
    %2 = arith.cmpi ne, %1, %c0_i32_0 : i32
    scf.if %2 {
      %cst = arith.constant 0.000000e+00 : f32
      %29 = vector.broadcast %cst : f32 to vector<1x128xf32>
      %c0_13 = arith.constant 0 : index
      %c0_14 = arith.constant 0 : index
      %30 = vector.load %arg6[%c0_13, %c0_14] : memref<1x128xf32, #tpu.memory_space<vmem>>, vector<1x128xf32>
      tpu.vector_store %arg6[%c0_13, %c0_14], %29 {strides = array<i32>} : memref<1x128xf32, #tpu.memory_space<vmem>>, vector<1x128xf32>,
      %cst_15 = arith.constant 0.000000e+00 : f32
      %31 = vector.broadcast %cst_15 : f32 to vector<1x128xf32>
      %c0_16 = arith.constant 0 : index
      %c0_17 = arith.constant 0 : index
      %32 = vector.load %arg7[%c0_16, %c0_17] : memref<1x128xf32, #tpu.memory_space<vmem>>, vector<1x128xf32>
      tpu.vector_store %arg7[%c0_16, %c0_17], %31 {strides = array<i32>} : memref<1x128xf32, #tpu.memory_space<vmem>>, vector<1x128xf32>,
    } else {
    }
    %c0 = arith.constant 0 : index
    %c0_1 = arith.constant 0 : index
    %3 = vector.load %arg3[%c0, %c0_1] : memref<16x128xf32, #tpu.memory_space<vmem>>, vector<16x128xf32>
    %c0_2 = arith.constant 0 : index
    %c0_3 = arith.constant 0 : index
    %4 = vector.load %arg2[%c0_2, %c0_3] : memref<16x128xf32, #tpu.memory_space<vmem>>, vector<16x128xf32>
    %5 = arith.subf %4, %3 : vector<16x128xf32>
    %6 = arith.mulf %5, %5 : vector<16x128xf32>
    %c1_i32 = arith.constant 1 : i32
    %7 = tpu.dynamic_rotate %3 by %c1_i32 dim 1 : vector<16x128xf32>, i32 -> vector<16x128xf32>
    %c1_i32_4 = arith.constant 1 : i32
    %8 = tpu.dynamic_rotate %6 by %c1_i32_4 dim 1 : vector<16x128xf32>, i32 -> vector<16x128xf32>
    %9 = arith.addf %3, %7 : vector<16x128xf32>
    %10 = arith.addf %6, %8 : vector<16x128xf32>
    %11 = tpu.iota {dimensions = array<i32: 1>} : vector<1x128xi32>
    %c1_i32_5 = arith.constant 1 : i32
    %12 = tpu.dynamic_rotate %11 by %c1_i32_5 dim 1 : vector<1x128xi32>, i32 -> vector<1x128xi32>
    %c1_i32_6 = arith.constant 1 : i32
    %13 = vector.broadcast %c1_i32_6 : i32 to vector<1x128xi32>
    %14 = arith.xori %11, %13 : vector<1x128xi32>
    %15 = arith.cmpi eq, %12, %14 : vector<1x128xi32>
    %c1_i32_7 = arith.constant 1 : i32
    %16 = arith.muli %arg0, %c1_i32_7 : i32
    %17 = arith.addi %16, %arg1 : i32
    %c1_i32_8 = arith.constant 1 : i32
    %18 = arith.addi %17, %c1_i32_8 : i32
    %c16_i32 = arith.constant 16 : i32
    %19 = arith.muli %18, %c16_i32 : i32
    %c10_i32 = arith.constant 10 : i32
    %20 = arith.cmpi sle, %19, %c10_i32 : i32
    %21 = arith.extui %20 : i1 to i32
    %c0_i32_9 = arith.constant 0 : i32
    %22 = arith.cmpi ne, %21, %c0_i32_9 : i32
    scf.if %22 {
      %cst = arith.constant 0.000000e+00 : f32
      %29 = vector.broadcast %cst : f32 to vector<16x128xf32>
      %30 = arith.cmpf one, %9, %29 : vector<16x128xf32>
      %31 = vector.broadcast %15 : vector<1x128xi1> to vector<16x128xi1>
      %32 = arith.andi %30, %31 : vector<16x128xi1>
      %cst_13 = arith.constant 0.000000e+00 : f32
      %33 = vector.broadcast %cst_13 : f32 to vector<16x128xf32>
      %34 = arith.select %32, %10, %33 : vector<16x128xi1>, vector<16x128xf32>
      %cst_14 = arith.constant 2.000000e+00 : f32
      %cst_15 = arith.constant 0.000000e+00 : f32
      %35 = vector.broadcast %cst_14 : f32 to vector<16x128xf32>
      %36 = vector.broadcast %cst_15 : f32 to vector<16x128xf32>
      %37 = arith.select %32, %35, %36 : vector<16x128xi1>, vector<16x128xf32>
      %c0_16 = arith.constant 0 : index
      %c0_17 = arith.constant 0 : index
      %38 = vector.load %arg6[%c0_16, %c0_17] : memref<1x128xf32, #tpu.memory_space<vmem>>, vector<1x128xf32>
      %cst_18 = arith.constant dense<0.000000e+00> : vector<128xf32>
      %39 = vector.multi_reduction <add>, %34, %cst_18 [0] : vector<16x128xf32> to vector<128xf32>
      %40 = vector.shape_cast %39 : vector<128xf32> to vector<1x128xf32>
      %41 = arith.addf %38, %40 : vector<1x128xf32>
      %c0_19 = arith.constant 0 : index
      %c0_20 = arith.constant 0 : index
      %42 = vector.load %arg6[%c0_19, %c0_20] : memref<1x128xf32, #tpu.memory_space<vmem>>, vector<1x128xf32>
      tpu.vector_store %arg6[%c0_19, %c0_20], %41 {strides = array<i32>} : memref<1x128xf32, #tpu.memory_space<vmem>>, vector<1x128xf32>,
      %c0_21 = arith.constant 0 : index
      %c0_22 = arith.constant 0 : index
      %43 = vector.load %arg7[%c0_21, %c0_22] : memref<1x128xf32, #tpu.memory_space<vmem>>, vector<1x128xf32>
      %cst_23 = arith.constant dense<0.000000e+00> : vector<128xf32>
      %44 = vector.multi_reduction <add>, %37, %cst_23 [0] : vector<16x128xf32> to vector<128xf32>
      %45 = vector.shape_cast %44 : vector<128xf32> to vector<1x128xf32>
      %46 = arith.addf %43, %45 : vector<1x128xf32>
      %c0_24 = arith.constant 0 : index
      %c0_25 = arith.constant 0 : index
      %47 = vector.load %arg7[%c0_24, %c0_25] : memref<1x128xf32, #tpu.memory_space<vmem>>, vector<1x128xf32>
      tpu.vector_store %arg7[%c0_24, %c0_25], %46 {strides = array<i32>} : memref<1x128xf32, #tpu.memory_space<vmem>>, vector<1x128xf32>,
    } else {
    }
    %true = arith.constant true
    %23 = arith.xori %20, %true : i1
    %24 = arith.extui %23 : i1 to i32
    %c0_i32_10 = arith.constant 0 : i32
    %25 = arith.cmpi ne, %24, %c0_i32_10 : i32
    scf.if %25 {
      %29 = tpu.iota {dimensions = array<i32: 0>} : vector<16x128xi32>
      %c16_i32_13 = arith.constant 16 : i32
      %30 = arith.muli %17, %c16_i32_13 : i32
      %c10_i32_14 = arith.constant 10 : i32
      %31 = arith.subi %c10_i32_14, %30 : i32
      %32 = vector.broadcast %31 : i32 to vector<16x128xi32>
      %33 = arith.cmpi slt, %29, %32 : vector<16x128xi32>
      %cst = arith.constant 0.000000e+00 : f32
      %34 = vector.broadcast %cst : f32 to vector<16x128xf32>
      %35 = arith.cmpf one, %9, %34 : vector<16x128xf32>
      %36 = vector.broadcast %15 : vector<1x128xi1> to vector<16x128xi1>
      %37 = arith.andi %35, %36 : vector<16x128xi1>
      %38 = arith.andi %37, %33 : vector<16x128xi1>
      %cst_15 = arith.constant 0.000000e+00 : f32
      %39 = vector.broadcast %cst_15 : f32 to vector<16x128xf32>
      %40 = arith.select %38, %10, %39 : vector<16x128xi1>, vector<16x128xf32>
      %cst_16 = arith.constant 2.000000e+00 : f32
      %cst_17 = arith.constant 0.000000e+00 : f32
      %41 = vector.broadcast %cst_16 : f32 to vector<16x128xf32>
      %42 = vector.broadcast %cst_17 : f32 to vector<16x128xf32>
      %43 = arith.select %38, %41, %42 : vector<16x128xi1>, vector<16x128xf32>
      %c0_18 = arith.constant 0 : index
      %c0_19 = arith.constant 0 : index
      %44 = vector.load %arg6[%c0_18, %c0_19] : memref<1x128xf32, #tpu.memory_space<vmem>>, vector<1x128xf32>
      %cst_20 = arith.constant dense<0.000000e+00> : vector<128xf32>
      %45 = vector.multi_reduction <add>, %40, %cst_20 [0] : vector<16x128xf32> to vector<128xf32>
      %46 = vector.shape_cast %45 : vector<128xf32> to vector<1x128xf32>
      %47 = arith.addf %44, %46 : vector<1x128xf32>
      %c0_21 = arith.constant 0 : index
      %c0_22 = arith.constant 0 : index
      %48 = vector.load %arg6[%c0_21, %c0_22] : memref<1x128xf32, #tpu.memory_space<vmem>>, vector<1x128xf32>
      tpu.vector_store %arg6[%c0_21, %c0_22], %47 {strides = array<i32>} : memref<1x128xf32, #tpu.memory_space<vmem>>, vector<1x128xf32>,
      %c0_23 = arith.constant 0 : index
      %c0_24 = arith.constant 0 : index
      %49 = vector.load %arg7[%c0_23, %c0_24] : memref<1x128xf32, #tpu.memory_space<vmem>>, vector<1x128xf32>
      %cst_25 = arith.constant dense<0.000000e+00> : vector<128xf32>
      %50 = vector.multi_reduction <add>, %43, %cst_25 [0] : vector<16x128xf32> to vector<128xf32>
      %51 = vector.shape_cast %50 : vector<128xf32> to vector<1x128xf32>
      %52 = arith.addf %49, %51 : vector<1x128xf32>
      %c0_26 = arith.constant 0 : index
      %c0_27 = arith.constant 0 : index
      %53 = vector.load %arg7[%c0_26, %c0_27] : memref<1x128xf32, #tpu.memory_space<vmem>>, vector<1x128xf32>
      tpu.vector_store %arg7[%c0_26, %c0_27], %52 {strides = array<i32>} : memref<1x128xf32, #tpu.memory_space<vmem>>, vector<1x128xf32>,
    } else {
    }
    %c0_i32_11 = arith.constant 0 : i32
    %26 = arith.cmpi eq, %arg1, %c0_i32_11 : i32
    %27 = arith.extui %26 : i1 to i32
    %c0_i32_12 = arith.constant 0 : i32
    %28 = arith.cmpi ne, %27, %c0_i32_12 : i32
    scf.if %28 {
      %c0_13 = arith.constant 0 : index
      %c0_14 = arith.constant 0 : index
      %29 = vector.load %arg6[%c0_13, %c0_14] : memref<1x128xf32, #tpu.memory_space<vmem>>, vector<1x128xf32>
      %c0_15 = arith.constant 0 : index
      %c0_16 = arith.constant 0 : index
      %c0_17 = arith.constant 0 : index
      %30 = vector.load %arg4[%c0_15, %c0_16, %c0_17] : memref<1x1x128xf32, #tpu.memory_space<vmem>>, vector<1x1x128xf32>
      %31 = vector.shape_cast %30 : vector<1x1x128xf32> to vector<1x128xf32>
      %32 = vector.shape_cast %29 : vector<1x128xf32> to vector<1x1x128xf32>
      tpu.vector_store %arg4[%c0_15, %c0_16, %c0_17], %32 {strides = array<i32>} : memref<1x1x128xf32, #tpu.memory_space<vmem>>, vector<1x1x128xf32>,
      %c0_18 = arith.constant 0 : index
      %c0_19 = arith.constant 0 : index
      %33 = vector.load %arg7[%c0_18, %c0_19] : memref<1x128xf32, #tpu.memory_space<vmem>>, vector<1x128xf32>
      %c0_20 = arith.constant 0 : index
      %c0_21 = arith.constant 0 : index
      %c0_22 = arith.constant 0 : index
      %34 = vector.load %arg5[%c0_20, %c0_21, %c0_22] : memref<1x1x128xf32, #tpu.memory_space<vmem>>, vector<1x1x128xf32>
      %35 = vector.shape_cast %34 : vector<1x1x128xf32> to vector<1x128xf32>
      %36 = vector.shape_cast %33 : vector<1x128xf32> to vector<1x1x128xf32>
      tpu.vector_store %arg5[%c0_20, %c0_21, %c0_22], %36 {strides = array<i32>} : memref<1x1x128xf32, #tpu.memory_space<vmem>>, vector<1x1x128xf32>,
    } else {
    }
    return
  }
  func.func @transform_0(%arg0: i32, %arg1: i32) -> (i32, i32) {
    %c1_i32 = arith.constant 1 : i32
    %0 = arith.muli %arg0, %c1_i32 : i32
    %1 = arith.addi %0, %arg1 : i32
    %c0_i32 = arith.constant 0 : i32
    %2 = arith.minsi %1, %c0_i32 : i32
    %c0_i32_0 = arith.constant 0 : i32
    %c0_i32_1 = arith.constant 0 : i32
    return %2, %c0_i32_0 : i32, i32
  }
  func.func @transform_1(%arg0: i32, %arg1: i32) -> (i32, i32) {
    %c1_i32 = arith.constant 1 : i32
    %0 = arith.muli %arg0, %c1_i32 : i32
    %1 = arith.addi %0, %arg1 : i32
    %c0_i32 = arith.constant 0 : i32
    %2 = arith.minsi %1, %c0_i32 : i32
    %c0_i32_0 = arith.constant 0 : i32
    %c0_i32_1 = arith.constant 0 : i32
    return %2, %c0_i32_0 : i32, i32
  }
  func.func @transform_2(%arg0: i32, %arg1: i32) -> (i32, i32, i32) {
    %c0_i32 = arith.constant 0 : i32
    %c0_i32_0 = arith.constant 0 : i32
    %c0_i32_1 = arith.constant 0 : i32
    return %arg0, %c0_i32, %c0_i32_0 : i32, i32, i32
  }
  func.func @transform_3(%arg0: i32, %arg1: i32) -> (i32, i32, i32) {
    %c0_i32 = arith.constant 0 : i32
    %c0_i32_0 = arith.constant 0 : i32
    %c0_i32_1 = arith.constant 0 : i32
    return %arg0, %c0_i32, %c0_i32_0 : i32, i32, i32
  }
}

</mosaic_0001>

<bundles_post_ra>
// kernel: tpu_custom_call.1
= control target key start
LH: loop header
LB: loop body
LE: loop exit
PB: predicated region body
PF: predicated region fallthrough
CT: control target
= control target key end

     0   :  { %9 = vsyncpa [#allocation5], 0  ;;  %s415_s0 = inlined_call_operand.hbm [shape: f32[10,128], index: 0, kind: input, shape index: {}]   ;;  %s416_s1 = inlined_call_operand.hbm [shape: f32[10,128], index: 1, kind: input, shape index: {}]   ;;  %s417_s2 = inlined_call_operand.hbm [shape: f32[1,1,128], index: 2, kind: output, shape index: {0}]   ;;  %s418_s3 = inlined_call_operand.hbm [shape: f32[1,1,128], index: 3, kind: output, shape index: {1}]  }
   0x1   :  { %10 = vsyncpa [#allocation8], 0 }
   0x2   :  { %11 = vsyncpa [#allocation6], 0 }
   0x3   :  { %12 = vsyncpa [#allocation11], 0  ;;  %s330_s12 = smov [#allocation4]   ;;  %s234_s16 = scalar_lea.hbm %s415_s0, 256 }
   0x4   :  { %s24_s13 = sshll.u32 %s330_s12, 4  ;;  %p235_p0 = scmp.ne.s32.totalorder %s415_s0, %s234_s16  ;;  %s25_s13 = int_to_ptr.vmem [resolvable:$true] %s24_s13 }
   0x5   :  { %p238_p1 = scmp.lt.u32.totalorder %s234_s16, %s415_s0 }
   0x7   :  { %p240_p2 = pnand %p238_p1, %p235_p0 }
   0x9   :  { %243 = shalt.err (!%p240_p2)
}
   0xa   :  { %s244_s21 = scalar_lea.vmem %s25_s13, 256  ;;  %p249_p4 = scmp.lt.s32.totalorder %s25_s13, %s25_s13 }
   0xb   :  { %p245_p3 = scmp.ne.s32.totalorder %s25_s13, %s244_s21  ;;  %p250_p5 = scmp.lt.s32.totalorder %s244_s21, %s244_s21 }
   0xd   :  { %p251_p6 = por %p250_p5, %p249_p4 }
   0xf   :  { %p252_p7 = pnand %p251_p6, %p245_p3 }
  0x11   :  { %255 = shalt.err (!%p252_p7)
}
  0x12   :  { %s331_s22 = smov 128   ;;  %s332_s23 = smov 8  }
  0x13   :  { %30 = dma.hbm_to_vmem [thread:$0]  %s415_s0, 256, %s25_s13, [#allocation5], %s331_s22, %s331_s22, %s332_s23  }
  0x14   :  { %s333_s26 = smov [#allocation7]   ;;  %s256_s30 = scalar_lea.hbm %s416_s1, 256 }
  0x15   :  { %s42_s27 = sshll.u32 %s333_s26, 4  ;;  %p257_p8 = scmp.ne.s32.totalorder %s416_s1, %s256_s30  ;;  %s43_s27 = int_to_ptr.vmem [resolvable:$true] %s42_s27 }
  0x16   :  { %p260_p9 = scmp.lt.u32.totalorder %s256_s30, %s416_s1 }
  0x18   :  { %p262_p10 = pnand %p260_p9, %p257_p8 }
  0x1a   :  { %265 = shalt.err (!%p262_p10)
}
  0x1b   :  { %s266_s8 = scalar_lea.vmem %s43_s27, 256  ;;  %p271_p12 = scmp.lt.s32.totalorder %s43_s27, %s43_s27 }
  0x1c   :  { %p267_p11 = scmp.ne.s32.totalorder %s43_s27, %s266_s8  ;;  %p272_p13 = scmp.lt.s32.totalorder %s266_s8, %s266_s8 }
  0x1e   :  { %p273_p0 = por %p272_p13, %p271_p12 }
  0x20   :  { %p274_p1 = pnand %p273_p0, %p267_p11 }
  0x22   :  { %277 = shalt.err (!%p274_p1)
}
  0x23   :  { %48 = dma.hbm_to_vmem [thread:$0]  %s416_s1, 256, %s43_s27, [#allocation8], %s331_s22, %s331_s22, %s332_s23  }
  0x24   :  { %322 = dma.done.wait [#allocation5], 256  }
  0x25   :  { %323 = vsyncadd [#allocation5], 4294967040 }
  0x26   :  { %324 = dma.done.wait [#allocation8], 256  }
  0x27   :  { %325 = vsyncadd [#allocation8], 4294967040  ;;  %v89_v0 = vlaneseq  ;;  %v334_v1 = vmov 0.0   ;;  %s335_s10 = smov 1   ;;  %v70_v3 = vld [vmem:[#allocation7 + $0x8] sm:$0xff]  ;;  %v72_v4 = vld [vmem:[#allocation4 + $0x8] sm:$0xff] }
  0x28   :  { %67 = vst [vmem:[#allocation2] sm:$0x1] %v334_v1  ;;  %68 = vst [vmem:[#allocation3] sm:$0x1] %v334_v1  ;;  %v69_v5 = vld [vmem:[#allocation7] sm:$0xff]  ;;  %v74_v6 = vsub.f32 %v72_v4, %v70_v3  ;;  %v71_v7 = vld [vmem:[#allocation4] sm:$0xff] }
  0x29   :  { %v90_v2 = vand.u32 127, %v89_v0  ;;  %77 = vrot.lane.b32.xlu1 %v69_v5, %s335_s10  ;;  %v73_v8 = vsub.f32 %v71_v7, %v69_v5  ;;  %v141_v11 = vshrl.u32 %v89_v0, 7  ;;  %v336_v15 = vmov 0   ;;  %s337_s1 = smov [#allocation10]   ;;  %s338_s12 = smov [#allocation9]  }
  0x2a   :  { %v76_v9 = vmul.f32 %v74_v6, %v74_v6  ;;  %s207_s11 = sshll.u32 %s337_s1, 4  ;;  %s197_s13 = sshll.u32 %s338_s12, 4  ;;  %s208_s11 = int_to_ptr.vmem [resolvable:$true] %s207_s11  ;;  %s383_s13 = int_to_ptr.vmem [resolvable:$true] %s197_s13 }
  0x2b   :  { %91 = vrot.lane.b32.xlu0 %v90_v2, %s335_s10  ;;  %v75_v10 = vmul.f32 %v73_v8, %v73_v8  ;;  %v93_v12 = vxor.u32 1, %v90_v2  ;;  %v153_v13 = vsub.s32 0, %v141_v11  ;;  %v142_v17 = vadd.s32 8, %v141_v11  ;;  %s278_s14 = scalar_lea.vmem %s208_s11, 16  ;;  %s282_s15 = scalar_lea.vmem %s208_s11, 32 }
  0x2c   :  { %p279_p2 = scmp.ne.s32.totalorder %s208_s11, %s278_s14  ;;  %p283_p3 = scmp.lt.s32.totalorder %s208_s11, %s208_s11 }
  0x2d   :  { %81 = vrot.lane.b32.xlu1 %v75_v10, %s335_s10  ;;  %vm147_vm1 = vcmp.lt.s32.totalorder %v142_v17, 10  ;;  %p284_p4 = scmp.lt.s32.totalorder %s282_s15, %s278_s14 }
  0x2f   :  { %79 = vrot.lane.b32.xlu0 %v70_v3, %s335_s10  ;;  %v174_v42 = vld [vmem:[#allocation3] sm:$0x1]  ;;  %v164_v45 = vld [vmem:[#allocation2] sm:$0x1]  ;;  %p285_p5 = por %p284_p4, %p283_p3 }
  0x31   :  { %p286_p6 = pnand %p285_p5, %p279_p2 }
  0x33   :  { %83 = vrot.lane.b32.xlu0 %v76_v9, %s335_s10 }
  0x9b   :  { %v78_v20 = vpop.permute.xlu1 %77 }
  0x9c   :  { %v85_v22 = vadd.f32 %v78_v20, %v69_v5 }
  0x9d   :  { %v92_v14 = vpop.permute.xlu0 %91 }
  0x9e   :  { %vm94_vm0 = vcmp.eq.s32.totalorder %v92_v14, %v93_v12  ;;  %vm148_vm4 = vcmp.ne.f32.partialorder %v85_v22, 0.0 }
  0x9f   :  { %v150_v16 = vsel %vm94_vm0, 1, %v336_v15  ;;  %v82_v25 = vpop.permute.xlu1 %81 }
  0xa0   :  { %v154_v18 = vrot.slane %v150_v16, %v153_v13  ;;  %v87_v27 = vadd.f32 %v82_v25, %v75_v10 }
  0xa1   :  { %v80_v19 = vpop.permute.xlu0 %79 }
  0xa2   :  { %v86_v21 = vadd.f32 %v80_v19, %v70_v3  ;;  %vm155_vm2 = vcmp.eq.s32.totalorder %v154_v18, 1 }
  0xa3   :  { %vm156_vm7 = vmand %vm148_vm4, %vm155_vm2 }
  0xa4   :  { %vm149_vm3 = vcmp.ne.f32.partialorder %v86_v21, 0.0  ;;  %v162_v28 = vsel %vm156_vm7, 2.0, %v334_v1  ;;  %v160_v31 = vsel %vm156_vm7, %v87_v27, 0.0 }
  0xa5   :  { %vm157_vm5 = vmand %vm149_vm3, %vm155_vm2  ;;  %v84_v23 = vpop.permute.xlu0 %83 }
  0xa6   :  { %vm159_vm6 = vmand %vm157_vm5, %vm147_vm1  ;;  %v88_v24 = vadd.f32 %v84_v23, %v76_v9 }
  0xa7   :  { %v163_v26 = vsel %vm159_vm6, 2.0, %v334_v1 }
  0xa8   :  { %v161_v29 = vsel %vm159_vm6, %v88_v24, 0.0  ;;  %v175_v30 = vadd.f32 %v163_v26, %v162_v28 }
  0xa9   :  { %v165_v32 = vadd.f32 %v161_v29, %v160_v31 }
  0xaa   :  { %v176_v33 = vrot.slane %v175_v30, 4 }
  0xab   :  { %v166_v34 = vrot.slane %v165_v32, 4 }
  0xac   :  { %v177_v35 = vadd.f32 %v176_v33, %v175_v30 }
  0xad   :  { %v167_v36 = vadd.f32 %v166_v34, %v165_v32 }
  0xae   :  { %v178_v37 = vrot.slane %v177_v35, 2 }
  0xaf   :  { %v168_v38 = vrot.slane %v167_v36, 2 }
  0xb0   :  { %v179_v39 = vadd.f32 %v178_v37, %v177_v35 }
  0xb1   :  { %v169_v40 = vadd.f32 %v168_v38, %v167_v36 }
  0xb2   :  { %v180_v41 = vrot.slane %v179_v39, 1 }
  0xb3   :  { %v170_v43 = vrot.slane %v169_v40, 1 }
  0xb4   :  { %v181_v44 = vadd.f32 %v180_v41, %v179_v39 }
  0xb5   :  { %v171_v46 = vadd.f32 %v170_v43, %v169_v40 }
  0xb6   :  { %v182_v47 = vadd.f32 %v181_v44, %v174_v42 }
  0xb7   :  { %v172_v48 = vadd.f32 %v171_v46, %v164_v45 }
  0xb8   :  { %183 = vst [vmem:[#allocation3] sm:$0x1] %v182_v47 }
  0xb9   :  { %173 = vst [vmem:[#allocation2] sm:$0x1] %v172_v48 }
  0xbf   :  { %v189_v49 = vld [vmem:[#allocation3] sm:$0x1] }
  0xc0   :  { %v187_v50 = vld [vmem:[#allocation2] sm:$0x1]  ;;  %190 = vst [vmem:[#allocation10] sm:$0x1] %v189_v49 }
  0xc1   :  { %188 = vst [vmem:[#allocation9] sm:$0x1] %v187_v50 }
  0xc2   :  { %289 = shalt.err (!%p286_p6)
}
  0xc3   :  { %s290_s18 = scalar_lea.hbm %s418_s3, 16 }
  0xc4   :  { %p291_p7 = scmp.ne.s32.totalorder %s418_s3, %s290_s18  ;;  %p294_p8 = scmp.lt.u32.totalorder %s290_s18, %s418_s3 }
  0xc6   :  { %p296_p9 = pnand %p294_p8, %p291_p7 }
  0xc8   :  { %299 = shalt.err (!%p296_p9)
}
  0xc9   :  { %210 = dma.vmem_to_hbm [thread:$0]  %s208_s11, 16, %s418_s3, [#allocation11]  }
  0xca   :  { %s300_s25 = scalar_lea.vmem %s383_s13, 16  ;;  %s304_s26 = scalar_lea.vmem %s383_s13, 32 }
  0xcb   :  { %p301_p10 = scmp.ne.s32.totalorder %s383_s13, %s300_s25  ;;  %p305_p11 = scmp.lt.s32.totalorder %s383_s13, %s383_s13 }
  0xcc   :  { %p306_p12 = scmp.lt.s32.totalorder %s304_s26, %s300_s25 }
  0xce   :  { %p307_p13 = por %p306_p12, %p305_p11 }
  0xd0   :  { %p308_p0 = pnand %p307_p13, %p301_p10 }
  0xd2   :  { %311 = shalt.err (!%p308_p0)
}
  0xd3   :  { %s312_s29 = scalar_lea.hbm %s417_s2, 16 }
  0xd4   :  { %p313_p1 = scmp.ne.s32.totalorder %s417_s2, %s312_s29  ;;  %p316_p2 = scmp.lt.u32.totalorder %s312_s29, %s417_s2 }
  0xd6   :  { %p318_p3 = pnand %p316_p2, %p313_p1 }
  0xd8   :  { %321 = shalt.err (!%p318_p3)
}
  0xd9   :  { %200 = dma.vmem_to_hbm [thread:$0]  %s383_s13, 16, %s417_s2, [#allocation6]  }
  0xda   :  { %326 = dma.done.wait [#allocation6], 16  }
  0xdb   :  { %327 = vsyncadd [#allocation6], 4294967280 }
  0xdc   :  { %328 = dma.done.wait [#allocation11], 16  }
  0xdd   :  { %329 = vsyncadd [#allocation11], 4294967280 }
  0xde   :  { %217 = vsyncpa [#allocation5], 1 }
  0xdf   :  { %218 = vsyncpa [#allocation8], 1 }
  0xe0   :  { %219 = vsyncpa [#allocation6], 1 }
  0xe1   :  { %220 = vsyncpa [#allocation11], 1 }

</bundles_post_ra>
